<compile_context>
chip_gen: v6e
topology: v6e:2x2x1
jax: 0.10.0
libtpu: 0.0.40
codegen_flags: <defaults>
</compile_context>

<pallas_src>
import jax
import jax.numpy as jnp
from jax import lax
from jax.experimental import pallas as pl
from jax.experimental.pallas import tpu as pltpu

_LANES = 128


def _round_up(a, m):
    return ((a + m - 1) // m) * m


def _logit_kernel(b_ref, x_ref, w_ref, o_ref):
    # x_ref: (tile_rows, width) lane-packed VMEM tile
    # w_ref: (width, ncols) block-diagonal weight -> MXU does the reduction
    # b_ref: (1,) SMEM scalar bias
    # o_ref: (ncols, tile_rows) lane-dense output block
    z = jnp.dot(
        x_ref[...], w_ref[...],
        preferred_element_type=jnp.float32,
        precision=lax.Precision.HIGHEST,
    )                                   # (tile_rows, ncols)
    z = z.T + b_ref[0]                  # (ncols, tile_rows): cheap XLU transpose
    o_ref[...] = jax.nn.sigmoid(z).astype(o_ref.dtype)


def logit_model_forward(x, weight, bias, *, max_block_rows=16384):
    """x: (B, F); weight: (1, F); bias: (1,)  ->  (B, 1) float32."""
    B, F = x.shape
    x = x.astype(jnp.float32)
    w = weight.reshape(-1).astype(jnp.float32)

    # ---- lane packing -------------------------------------------------------
    if F <= _LANES:
        f_pad = pl.next_power_of_2(F)          # power of two, divides 128
        pack = _LANES // f_pad
    else:
        f_pad = _round_up(F, _LANES)
        pack = 1
    width = pack * f_pad                       # 128 when F <= 128
    ncols = max(pack, 8)                       # sublane-aligned output columns
    rows = pl.cdiv(B, pack)                    # packed rows needed

    # ---- chip-aware tile sizing ---------------------------------------------
    kind = ""
    try:
        kind = jax.devices()[0].device_kind.lower()
    except Exception:
        pass
    is_v7x = ("v7" in kind) or ("7x" in kind)
    n_tc = 2 if is_v7x else 1                  # TensorCores per chip

    row_bytes = width * 4
    tile_bytes_target = (8 << 20) if is_v7x else (4 << 20)
    tile_rows = max(_LANES, tile_bytes_target // row_bytes)
    tile_rows = _round_up(min(tile_rows, int(max_block_rows)), _LANES)

    # Split the (parallel) batch axis across both TensorCores only on v7x and
    # only when each core still gets a multi-MiB tile.
    if n_tc > 1:
        min_split_rows = max(256, (1 << 20) // row_bytes)
        if rows >= n_tc * min_split_rows:
            tile_rows = min(tile_rows, _round_up(pl.cdiv(rows, n_tc), _LANES))

    if rows <= tile_rows:
        tile_rows = rows                       # single step, full-extent block
    else:
        g = pl.cdiv(rows, tile_rows)           # balance steps: shrink last-block waste
        tile_rows = min(tile_rows, _round_up(pl.cdiv(rows, g), _LANES))
    grid = (pl.cdiv(rows, tile_rows),)

    # ---- pack x without an extra HBM pad pass when possible ------------------
    if f_pad == F and B % pack == 0:
        x_packed = x.reshape(rows, width)      # free row-major reshape, no copy
    else:
        # ragged B or non-power-of-two F: one zero-pad pass (only case it's needed)
        x_p = jnp.zeros((rows * pack, f_pad), jnp.float32).at[:B, :F].set(x)
        x_packed = x_p.reshape(rows, width)

    # block-diagonal weight (width, ncols): column c reduces packed slot c
    w_pad = jnp.zeros((f_pad,), jnp.float32).at[:F].set(w)
    eye = jnp.eye(pack, ncols, dtype=jnp.float32)
    w_bd = (eye[:, None, :] * w_pad[None, :, None]).reshape(width, ncols)

    # ---- VMEM budget (only matters for very large tiles, e.g. v7x 8 MiB) -----
    vmem_need = 4 * (2 * tile_rows * width + 2 * ncols * tile_rows + width * ncols)
    cp_kwargs = {"dimension_semantics": ("parallel",)}
    if vmem_need > (14 << 20):
        cp_kwargs["vmem_limit_bytes"] = int(
            min(max(32 << 20, vmem_need + (8 << 20)), 60 << 20))

    out = pl.pallas_call(
        _logit_kernel,
        out_shape=jax.ShapeDtypeStruct((ncols, rows), jnp.float32),
        grid_spec=pltpu.PrefetchScalarGridSpec(
            num_scalar_prefetch=0,
            grid=grid,
            in_specs=[
                pl.BlockSpec(memory_space=pltpu.MemorySpace.SMEM),      # bias (1,)
                pl.BlockSpec((tile_rows, width), lambda i: (i, 0)),     # x tile
                pl.BlockSpec((width, ncols), lambda i: (0, 0)),         # weight
            ],
            out_specs=pl.BlockSpec((ncols, tile_rows), lambda i: (0, i)),
        ),
        compiler_params=pltpu.CompilerParams(**cp_kwargs),
    )(bias.astype(jnp.float32), x_packed, w_bd)

    # out[c, r] = sigmoid(<x[r*pack + c], w> + b) for c < pack; undo packing
    # (tiny: rows*pack*4 bytes) and drop rows beyond B.
    return out[:pack].T.reshape(rows * pack, 1)[:B]


def logit_model_ref(x, weight, bias):
    z = jnp.dot(x, weight.T, precision=lax.Precision.HIGHEST) + bias
    return jax.nn.sigmoid(z)


if __name__ == "__main__":
    key = jax.random.PRNGKey(0)
    keys = jax.random.split(key, 12)

    def make_case(kx, kw, kb, batch, n_features):
        x = jax.random.normal(kx, (batch, n_features), dtype=jnp.float32)
        bound = 1.0 / jnp.sqrt(jnp.float32(n_features))
        w = jax.random.uniform(kw, (1, n_features), jnp.float32, -bound, bound)
        b = jax.random.uniform(kb, (1,), jnp.float32, -bound, bound)
        return x, w, b

    # 1) small shape matching the module (torch.nn.Linear(n_features=32, 1))
    x, w, b = make_case(keys[0], keys[1], keys[2], 8, 32)
    y = jax.block_until_ready(logit_model_forward(x, w, b))
    assert y.shape == (8, 1)
    assert jnp.allclose(y, logit_model_ref(x, w, b), atol=1e-5, rtol=1e-5)

    # 2) ragged batch / non-power-of-two features (padded-pack fallback path)
    x, w, b = make_case(keys[3], keys[4], keys[5], 300, 20)
    y = jax.block_until_ready(logit_model_forward(x, w, b))
    assert y.shape == (300, 1)
    assert jnp.allclose(y, logit_model_ref(x, w, b), atol=1e-5, rtol=1e-5)

    # 3) free-reshape path with a multi-step grid and a partial last block
    x, w, b = make_case(keys[6], keys[7], keys[8], 1000, 32)
    y = jax.block_until_ready(logit_model_forward(x, w, b, max_block_rows=128))
    assert y.shape == (1000, 1)
    assert jnp.allclose(y, logit_model_ref(x, w, b), atol=1e-5, rtol=1e-5)

    # 4) wide-feature path (F > 128, pack == 1)
    x, w, b = make_case(keys[9], keys[10], keys[11], 64, 200)
    y = jax.block_until_ready(logit_model_forward(x, w, b))
    assert y.shape == (64, 1)
    assert jnp.allclose(y, logit_model_ref(x, w, b), atol=1e-5, rtol=1e-5)

    print("KERNEL_OK")
</pallas_src>

<mosaic_0001>
module attributes {stable_mosaic.version = 11 : i64} {
  func.func @_logit_kernel(%arg0: i32, %arg1: memref<1xf32, #tpu.memory_space<smem>>, %arg2: memref<2x128xf32, #tpu.memory_space<vmem>>, %arg3: memref<128x8xf32, #tpu.memory_space<vmem>>, %arg4: memref<8x2xf32, #tpu.memory_space<vmem>>) attributes {dimension_semantics = [#tpu.dimension_semantics<parallel>], iteration_bounds = array<i64: 1>, scalar_prefetch = 0 : i64, scratch_operands = 0 : i64, tpu.core_type = #tpu.core_type<tc>, window_params = [{transform_indices = @transform_0, window_bounds = array<i64: 1>}, {transform_indices = @transform_1, window_bounds = array<i64: 2, 128>}, {pipeline_mode = #tpu.pipeline_mode<synchronous>, transform_indices = @transform_2, window_bounds = array<i64: 128, 8>}, {transform_indices = @transform_3, window_bounds = array<i64: 8, 2>}]} {
    %c0 = arith.constant 0 : index
    %c0_0 = arith.constant 0 : index
    %0 = vector.load %arg2[%c0, %c0_0] : memref<2x128xf32, #tpu.memory_space<vmem>>, vector<2x128xf32>
    %c0_1 = arith.constant 0 : index
    %c0_2 = arith.constant 0 : index
    %1 = vector.load %arg3[%c0_1, %c0_2] : memref<128x8xf32, #tpu.memory_space<vmem>>, vector<128x8xf32>
    %cst = arith.constant dense<0.000000e+00> : vector<2x8xf32>
    %2 = tpu.matmul %0, %1, %cst {dimension_numbers = #tpu.dot_dimension_numbers<[1], [0], [0], [1], [0, 0, 1, 1], [], []>, precision = #tpu.contract_precision<fp32>} : vector<2x128xf32>, vector<128x8xf32>, vector<2x8xf32> -> vector<2x8xf32>
    %3 = tpu.transpose %2, [1, 0] : vector<2x8xf32> -> vector<8x2xf32>
    %c0_3 = arith.constant 0 : index
    %4 = memref.load %arg1[%c0_3] : memref<1xf32, #tpu.memory_space<smem>>
    %5 = vector.broadcast %4 : f32 to vector<8x2xf32>
    %6 = arith.addf %3, %5 : vector<8x2xf32>
    %7 = arith.negf %6 : vector<8x2xf32>
    %8 = math.exp %7 : vector<8x2xf32>
    %cst_4 = arith.constant 1.000000e+00 : f32
    %9 = vector.broadcast %cst_4 : f32 to vector<8x2xf32>
    %10 = arith.addf %9, %8 : vector<8x2xf32>
    %11 = arith.divf %9, %10 : vector<8x2xf32>
    %c0_5 = arith.constant 0 : index
    %c0_6 = arith.constant 0 : index
    %12 = vector.load %arg4[%c0_5, %c0_6] : memref<8x2xf32, #tpu.memory_space<vmem>>, vector<8x2xf32>
    tpu.vector_store %arg4[%c0_5, %c0_6], %11 {strides = array<i32>} : memref<8x2xf32, #tpu.memory_space<vmem>>, vector<8x2xf32>,
    return
  }
  func.func @transform_0(%arg0: i32) -> i32 {
    %c0_i32 = arith.constant 0 : i32
    %c0_i32_0 = arith.constant 0 : i32
    return %c0_i32 : i32
  }
  func.func @transform_1(%arg0: i32) -> (i32, i32) {
    %c0_i32 = arith.constant 0 : i32
    %c0_i32_0 = arith.constant 0 : i32
    return %arg0, %c0_i32 : i32, i32
  }
  func.func @transform_2(%arg0: i32) -> (i32, i32) {
    %c0_i32 = arith.constant 0 : i32
    %c0_i32_0 = arith.constant 0 : i32
    %c0_i32_1 = arith.constant 0 : i32
    return %c0_i32, %c0_i32_0 : i32, i32
  }
  func.func @transform_3(%arg0: i32) -> (i32, i32) {
    %c0_i32 = arith.constant 0 : i32
    %c0_i32_0 = arith.constant 0 : i32
    return %c0_i32, %arg0 : i32, i32
  }
}

</mosaic_0001>

<bundles_post_ra>
// kernel: tpu_custom_call.1
= control target key start
LH: loop header
LB: loop body
LE: loop exit
PB: predicated region body
PF: predicated region fallthrough
CT: control target
= control target key end

     0   :  { %v1039_v0 = vmov 0.0   ;;  %vm1040_vm0 = vmmov 0   ;;  %vm714_vm1 = vcmask 15360   ;;  %s1481_s2 = inlined_call_operand.vmem [shape: f32[128,8], index: 2, kind: input, shape index: {}]   ;;  %s1482_s1 = inlined_call_operand.vmem [shape: f32[2,128], index: 1, kind: input, shape index: {}]   ;;  %s1483_s0 = inlined_call_operand.<no memory space> [shape: f32[1], index: 0, kind: input, shape index: {}]   ;;  %s1484_s3 = inlined_call_operand.vmem [shape: f32[8,2], index: 3, kind: output, shape index: {}]  }
   0x1   :  { %823 = vmatprep.subr.mxu0 %v1039_v0  ;;  %v31_v1 = vld [vmem:[%s1481_s2 + $0x78] sm:$0xff]  ;;  %v30_v2 = vld [vmem:[%s1481_s2 + $0x70] sm:$0xff]  ;;  %v29_v3 = vld [vmem:[%s1481_s2 + $0x68] sm:$0xff]  ;;  %858 = vmatprep.subr.mxu1 %v1039_v0 }
   0x2   :  { %v1072_v4 = vand.u32 4294901760, %v31_v1  ;;  %v1074_v5 = vand.u32 4294901760, %v30_v2  ;;  %v1076_v6 = vand.u32 4294901760, %v29_v3  ;;  %v28_v7 = vld [vmem:[%s1481_s2 + $0x60] sm:$0xff]  ;;  %v27_v8 = vld [vmem:[%s1481_s2 + $0x58] sm:$0xff]  ;;  %v26_v9 = vld [vmem:[%s1481_s2 + $0x50] sm:$0xff]  ;;  %855 = vmatprep.mubr.msk.f32.mxu0 %vm1040_vm0, %v1039_v0  ;;  %890 = vmatprep.mubr.msk.f32.mxu1 %vm1040_vm0, %v1039_v0 }
   0x3   :  { %v1091_v10 = vand.u32 4294901760, %v28_v7  ;;  %v1093_v11 = vand.u32 4294901760, %v27_v8  ;;  %v1095_v12 = vand.u32 4294901760, %v26_v9  ;;  %v25_v13 = vld [vmem:[%s1481_s2 + $0x48] sm:$0xff]  ;;  %v24_v14 = vld [vmem:[%s1481_s2 + $0x40] sm:$0xff]  ;;  %v23_v19 = vld [vmem:[%s1481_s2 + $0x38] sm:$0xff] }
   0x4   :  { %824 = vmatpush3.msra.mxu0 %v1072_v4  ;;  %v1105_v15 = vsub.f32 %v31_v1, %v1072_v4  ;;  %v1108_v16 = vsub.f32 %v30_v2, %v1074_v5  ;;  %v1110_v17 = vand.u32 4294901760, %v25_v13  ;;  %v1113_v18 = vsub.f32 %v29_v3, %v1076_v6  ;;  %v22_v26 = vld [vmem:[%s1481_s2 + $0x30] sm:$0xff]  ;;  %v21_v36 = vld [vmem:[%s1481_s2 + $0x28] sm:$0xff]  ;;  %v20_v41 = vld [vmem:[%s1481_s2 + $0x20] sm:$0xff] }
   0x5   :  { %825 = vmatprep.subr.mxu0 %v1039_v0  ;;  %v1120_v20 = vsub.f32 %v28_v7, %v1091_v10  ;;  %v1123_v21 = vsub.f32 %v27_v8, %v1093_v11  ;;  %v1129_v25 = vand.u32 4294901760, %v24_v14  ;;  %v1136_v28 = vand.u32 4294901760, %v23_v19  ;;  %v19_v49 = vld [vmem:[%s1481_s2 + $0x18] sm:$0xff]  ;;  %v15_v50 = vld [vmem:[%s1482_s1] sm:$0x3]  ;;  %v18_v54 = vld [vmem:[%s1481_s2 + $0x10] sm:$0xff] }
   0x6   :  { %826 = vmatpush3.msra.mxu0 %v1074_v5  ;;  %v126_v22 = vand.u32 4294901760, %v1105_v15  ;;  %v133_v23 = vand.u32 4294901760, %v1108_v16  ;;  %v140_v24 = vand.u32 4294901760, %v1113_v18  ;;  %v1140_v30 = vsub.f32 %v26_v9, %v1095_v12  ;;  %v17_v60 = vld [vmem:[%s1481_s2 + $0x8] sm:$0xff]  ;;  %v16_v7 = vld [vmem:[%s1481_s2] sm:$0xff] }
   0x7   :  { %827 = vmatprep.subr.mxu0 %v1039_v0  ;;  %v147_v27 = vand.u32 4294901760, %v1120_v20  ;;  %v154_v29 = vand.u32 4294901760, %v1123_v21  ;;  %v1153_v34 = vsub.f32 %v25_v13, %v1110_v17  ;;  %v1156_v35 = vand.u32 4294901760, %v22_v26 }
   0x8   :  { %828 = vmatpush3.msra.mxu0 %v1076_v6  ;;  %v127_v31 = vsub.f32 %v1105_v15, %v126_v22  ;;  %v134_v32 = vsub.f32 %v1108_v16, %v133_v23  ;;  %v141_v33 = vsub.f32 %v1113_v18, %v140_v24  ;;  %v161_v40 = vand.u32 4294901760, %v1140_v30 }
   0x9   :  { %829 = vmatprep.subr.mxu0 %v1039_v0  ;;  %v148_v39 = vsub.f32 %v1120_v20, %v147_v27  ;;  %v155_v42 = vsub.f32 %v1123_v21, %v154_v29  ;;  %v1174_v43 = vsub.f32 %v24_v14, %v1129_v25  ;;  %v1177_v45 = vand.u32 4294901760, %v21_v36 }
   0xa   :  { %830 = vmatpush3.msra.mxu0 %v1091_v10  ;;  %v128_v37 = vand.u32 4294901760, %v127_v31  ;;  %v135_v38 = vand.u32 4294901760, %v134_v32  ;;  %v142_v44 = vand.u32 4294901760, %v141_v33  ;;  %v168_v46 = vand.u32 4294901760, %v1153_v34 }
   0xb   :  { %831 = vmatprep.subr.mxu0 %v1039_v0  ;;  %v1181_v47 = vsub.f32 %v23_v19, %v1136_v28  ;;  %v1185_v48 = vand.u32 4294901760, %v20_v41  ;;  %v149_v51 = vand.u32 4294901760, %v148_v39  ;;  %v162_v52 = vsub.f32 %v1140_v30, %v161_v40 }
   0xc   :  { %832 = vmatpush3.msra.mxu0 %v1093_v11  ;;  %859 = vmatpush3.msra.mxu1 %v128_v37  ;;  %v175_v53 = vand.u32 4294901760, %v1174_v43  ;;  %v1202_v55 = vsub.f32 %v22_v26, %v1156_v35  ;;  %v156_v56 = vand.u32 4294901760, %v155_v42  ;;  %v169_v58 = vsub.f32 %v1153_v34, %v168_v46 }
   0xd   :  { %833 = vmatprep.subr.mxu0 %v1039_v0  ;;  %860 = vmatprep.subr.mxu1 %v1039_v0  ;;  %v182_v57 = vand.u32 4294901760, %v1181_v47  ;;  %v1211_v59 = vand.u32 4294901760, %v19_v49  ;;  %v1217_v61 = vsub.f32 %v21_v36, %v1177_v45  ;;  %v1219_v62 = vand.u32 4294901760, %v15_v50 }
   0xe   :  { %834 = vmatpush3.msra.mxu0 %v1095_v12  ;;  %861 = vmatpush3.msra.mxu1 %v135_v38  ;;  %v1223_v63 = vand.u32 4294901760, %v18_v54  ;;  %v163_v1 = vand.u32 4294901760, %v162_v52  ;;  %v176_v2 = vsub.f32 %v1174_v43, %v175_v53  ;;  %v189_v3 = vand.u32 4294901760, %v1202_v55 }
   0xf   :  { %835 = vmatprep.subr.mxu0 %v1039_v0  ;;  %862 = vmatprep.subr.mxu1 %v1039_v0  ;;  %v1234_v8 = vsub.f32 %v20_v41, %v1185_v48  ;;  %v183_v9 = vsub.f32 %v1181_v47, %v182_v57  ;;  %v1241_v13 = vand.u32 4294901760, %v17_v60  ;;  %v170_v14 = vand.u32 4294901760, %v169_v58 }
  0x10   :  { %836 = vmatpush3.msra.mxu0 %v1110_v17  ;;  %863 = vmatpush3.msra.mxu1 %v142_v44  ;;  %v196_v19 = vand.u32 4294901760, %v1217_v61  ;;  %v1246_v26 = vsub.f32 %v15_v50, %v1219_v62  ;;  %v1249_v31 = vsub.f32 %v19_v49, %v1211_v59  ;;  %v1253_v32 = vand.u32 4294901760, %v16_v7 }
  0x11   :  { %837 = vmatprep.subr.mxu0 %v1039_v0  ;;  %864 = vmatprep.subr.mxu1 %v1039_v0  ;;  %v177_v33 = vand.u32 4294901760, %v176_v2  ;;  %v190_v36 = vsub.f32 %v1202_v55, %v189_v3  ;;  %v203_v37 = vand.u32 4294901760, %v1234_v8  ;;  %v1261_v38 = vsub.f32 %v18_v54, %v1223_v63 }
  0x12   :  { %838 = vmatpush3.msra.mxu0 %v1129_v25  ;;  %865 = vmatpush3.msra.mxu1 %v149_v51  ;;  %v184_v39 = vand.u32 4294901760, %v183_v9  ;;  %v197_v41 = vsub.f32 %v1217_v61, %v196_v19  ;;  %v115_v42 = vand.u32 4294901760, %v1246_v26  ;;  %v210_v44 = vand.u32 4294901760, %v1249_v31 }
  0x13   :  { %839 = vmatprep.subr.mxu0 %v1039_v0  ;;  %866 = vmatprep.subr.mxu1 %v1039_v0  ;;  %v1272_v49 = vsub.f32 %v17_v60, %v1241_v13  ;;  %v191_v50 = vand.u32 4294901760, %v190_v36  ;;  %v204_v51 = vsub.f32 %v1234_v8, %v203_v37  ;;  %v217_v52 = vand.u32 4294901760, %v1261_v38 }
  0x14   :  { %840 = vmatpush3.msra.mxu0 %v1136_v28  ;;  %867 = vmatpush3.msra.mxu1 %v156_v56  ;;  %v1282_v54 = vsub.f32 %v16_v7, %v1253_v32  ;;  %v198_v56 = vand.u32 4294901760, %v197_v41  ;;  %v116_v58 = vsub.f32 %v1246_v26, %v115_v42  ;;  %v211_v60 = vsub.f32 %v1249_v31, %v210_v44 }
  0x15   :  { %841 = vmatprep.subr.mxu0 %v1039_v0  ;;  %868 = vmatprep.subr.mxu1 %v1039_v0  ;;  %v205_v2 = vand.u32 4294901760, %v204_v51  ;;  %v218_v7 = vsub.f32 %v1261_v38, %v217_v52 }
  0x16   :  { %842 = vmatpush3.msra.mxu0 %v1156_v35  ;;  %869 = vmatpush3.msra.mxu1 %v163_v1  ;;  %v224_v1 = vand.u32 4294901760, %v1272_v49  ;;  %v231_v9 = vand.u32 4294901760, %v1282_v54 }
  0x17   :  { %843 = vmatprep.subr.mxu0 %v1039_v0  ;;  %870 = vmatprep.subr.mxu1 %v1039_v0 }
  0x18   :  { %844 = vmatpush3.msra.mxu0 %v1177_v45  ;;  %871 = vmatpush3.msra.mxu1 %v170_v14  ;;  %v117_v14 = vand.u32 4294901760, %v116_v58  ;;  %v225_v36 = vsub.f32 %v1272_v49, %v224_v1  ;;  %v232_v41 = vsub.f32 %v1282_v54, %v231_v9 }
  0x19   :  { %845 = vmatprep.subr.mxu0 %v1039_v0  ;;  %872 = vmatprep.subr.mxu1 %v1039_v0 }
  0x1a   :  { %846 = vmatpush3.msra.mxu0 %v1185_v48  ;;  %873 = vmatpush3.msra.mxu1 %v177_v33  ;;  %v212_v33 = vand.u32 4294901760, %v211_v60  ;;  %v233_v51 = vand.u32 4294901760, %v232_v41 }
  0x1b   :  { %847 = vmatprep.subr.mxu0 %v1039_v0  ;;  %874 = vmatprep.subr.mxu1 %v1039_v0 }
  0x1c   :  { %848 = vmatpush3.msra.mxu0 %v1211_v59  ;;  %875 = vmatpush3.msra.mxu1 %v184_v39  ;;  %v219_v39 = vand.u32 4294901760, %v218_v7 }
  0x1d   :  { %849 = vmatprep.subr.mxu0 %v1039_v0  ;;  %876 = vmatprep.subr.mxu1 %v1039_v0 }
  0x1e   :  { %850 = vmatpush3.msra.mxu0 %v1223_v63  ;;  %877 = vmatpush3.msra.mxu1 %v191_v50  ;;  %v226_v50 = vand.u32 4294901760, %v225_v36 }
  0x1f   :  { %851 = vmatprep.subr.mxu0 %v1039_v0  ;;  %878 = vmatprep.subr.mxu1 %v1039_v0 }
  0x20   :  { %852 = vmatpush3.msra.mxu0 %v1241_v13  ;;  %879 = vmatpush3.msra.mxu1 %v198_v56 }
  0x21   :  { %853 = vmatprep.subr.mxu0 %v1039_v0  ;;  %880 = vmatprep.subr.mxu1 %v1039_v0 }
  0x22   :  { %854 = vmatpush3.msra.mxu0 %v1253_v32  ;;  %881 = vmatpush3.msra.mxu1 %v205_v2 }
  0x23   :  { %882 = vmatprep.subr.mxu1 %v1039_v0  ;;  %893 = vmatprep.subr.mxu0 %v1039_v0 }
  0x24   :  { %856 = vmatmul.mubr.f32.vlgmr.msra.gmra.mxu0 %v117_v14  ;;  %883 = vmatpush3.msra.mxu1 %v212_v33 }
  0x25   :  { %894 = vmatpush3.msra.mxu0 %v1105_v15  ;;  %884 = vmatprep.subr.mxu1 %v1039_v0 }
  0x26   :  { %895 = vmatprep.subr.mxu0 %v1039_v0  ;;  %885 = vmatpush3.msra.mxu1 %v219_v39 }
  0x27   :  { %896 = vmatpush3.msra.mxu0 %v1108_v16  ;;  %886 = vmatprep.subr.mxu1 %v1039_v0 }
  0x28   :  { %897 = vmatprep.subr.mxu0 %v1039_v0  ;;  %887 = vmatpush3.msra.mxu1 %v226_v50 }
  0x29   :  { %898 = vmatpush3.msra.mxu0 %v1113_v18  ;;  %888 = vmatprep.subr.mxu1 %v1039_v0 }
  0x2a   :  { %899 = vmatprep.subr.mxu0 %v1039_v0  ;;  %889 = vmatpush3.msra.mxu1 %v233_v51 }
  0x2b   :  { %900 = vmatpush3.msra.mxu0 %v1120_v20  ;;  %891 = vmatmul.mubr.f32.vlgmr.msra.gmra.mxu1 %v1219_v62 }
  0x2c   :  { %901 = vmatprep.subr.mxu0 %v1039_v0  ;;  %928 = vmatprep.subr.mxu1 %v1039_v0 }
  0x2d   :  { %902 = vmatpush3.msra.mxu0 %v1123_v21  ;;  %929 = vmatpush3.msra.mxu1 %v1072_v4 }
  0x2e   :  { %903 = vmatprep.subr.mxu0 %v1039_v0  ;;  %930 = vmatprep.subr.mxu1 %v1039_v0 }
  0x2f   :  { %904 = vmatpush3.msra.mxu0 %v1140_v30  ;;  %931 = vmatpush3.msra.mxu1 %v1074_v5 }
  0x30   :  { %905 = vmatprep.subr.mxu0 %v1039_v0  ;;  %932 = vmatprep.subr.mxu1 %v1039_v0 }
  0x31   :  { %906 = vmatpush3.msra.mxu0 %v1153_v34  ;;  %933 = vmatpush3.msra.mxu1 %v1076_v6 }
  0x32   :  { %907 = vmatprep.subr.mxu0 %v1039_v0  ;;  %934 = vmatprep.subr.mxu1 %v1039_v0 }
  0x33   :  { %908 = vmatpush3.msra.mxu0 %v1174_v43  ;;  %935 = vmatpush3.msra.mxu1 %v1091_v10 }
  0x34   :  { %909 = vmatprep.subr.mxu0 %v1039_v0  ;;  %936 = vmatprep.subr.mxu1 %v1039_v0 }
  0x35   :  { %910 = vmatpush3.msra.mxu0 %v1181_v47  ;;  %937 = vmatpush3.msra.mxu1 %v1093_v11 }
  0x36   :  { %911 = vmatprep.subr.mxu0 %v1039_v0  ;;  %938 = vmatprep.subr.mxu1 %v1039_v0 }
  0x37   :  { %912 = vmatpush3.msra.mxu0 %v1202_v55  ;;  %939 = vmatpush3.msra.mxu1 %v1095_v12 }
  0x38   :  { %913 = vmatprep.subr.mxu0 %v1039_v0  ;;  %940 = vmatprep.subr.mxu1 %v1039_v0 }
  0x39   :  { %914 = vmatpush3.msra.mxu0 %v1217_v61  ;;  %941 = vmatpush3.msra.mxu1 %v1110_v17 }
  0x3a   :  { %915 = vmatprep.subr.mxu0 %v1039_v0  ;;  %942 = vmatprep.subr.mxu1 %v1039_v0 }
  0x3b   :  { %916 = vmatpush3.msra.mxu0 %v1234_v8  ;;  %943 = vmatpush3.msra.mxu1 %v1129_v25 }
  0x3c   :  { %917 = vmatprep.subr.mxu0 %v1039_v0  ;;  %944 = vmatprep.subr.mxu1 %v1039_v0 }
  0x3d   :  { %918 = vmatpush3.msra.mxu0 %v1249_v31  ;;  %945 = vmatpush3.msra.mxu1 %v1136_v28 }
  0x3e   :  { %919 = vmatprep.subr.mxu0 %v1039_v0  ;;  %946 = vmatprep.subr.mxu1 %v1039_v0 }
  0x3f   :  { %920 = vmatpush3.msra.mxu0 %v1261_v38  ;;  %947 = vmatpush3.msra.mxu1 %v1156_v35 }
  0x40   :  { %921 = vmatprep.subr.mxu0 %v1039_v0  ;;  %948 = vmatprep.subr.mxu1 %v1039_v0 }
  0x41   :  { %922 = vmatpush3.msra.mxu0 %v1272_v49  ;;  %949 = vmatpush3.msra.mxu1 %v1177_v45 }
  0x42   :  { %923 = vmatprep.subr.mxu0 %v1039_v0  ;;  %950 = vmatprep.subr.mxu1 %v1039_v0 }
  0x43   :  { %924 = vmatpush3.msra.mxu0 %v1282_v54  ;;  %925 = vmatprep.mubr.msk.f32.mxu0 %vm1040_vm0, %v1039_v0 }
  0x44   :  { %951 = vmatpush3.msra.mxu1 %v1185_v48  ;;  %926 = vmatmul.mubr.f32.vlgmr.msra.gmra.mxu0 %v1246_v26 }
  0x45   :  { %952 = vmatprep.subr.mxu1 %v1039_v0  ;;  %963 = vmatprep.subr.mxu0 %v1039_v0 }
  0x46   :  { %953 = vmatpush3.msra.mxu1 %v1211_v59  ;;  %964 = vmatpush3.msra.mxu0 %v126_v22 }
  0x47   :  { %954 = vmatprep.subr.mxu1 %v1039_v0  ;;  %965 = vmatprep.subr.mxu0 %v1039_v0 }
  0x48   :  { %955 = vmatpush3.msra.mxu1 %v1223_v63  ;;  %966 = vmatpush3.msra.mxu0 %v133_v23 }
  0x49   :  { %956 = vmatprep.subr.mxu1 %v1039_v0  ;;  %967 = vmatprep.subr.mxu0 %v1039_v0 }
  0x4a   :  { %957 = vmatpush3.msra.mxu1 %v1241_v13  ;;  %968 = vmatpush3.msra.mxu0 %v140_v24 }
  0x4b   :  { %958 = vmatprep.subr.mxu1 %v1039_v0  ;;  %969 = vmatprep.subr.mxu0 %v1039_v0 }
  0x4c   :  { %959 = vmatpush3.msra.mxu1 %v1253_v32  ;;  %960 = vmatprep.mubr.msk.f32.mxu1 %vm1040_vm0, %v1039_v0 }
  0x4d   :  { %970 = vmatpush3.msra.mxu0 %v147_v27  ;;  %961 = vmatmul.mubr.f32.vlgmr.msra.gmra.mxu1 %v115_v42  ;;  %v706_v27 = vstv %s1483_s0 }
  0x4e   :  { %971 = vmatprep.subr.mxu0 %v1039_v0  ;;  %998 = vmatprep.subr.mxu1 %v1039_v0 }
  0x4f   :  { %972 = vmatpush3.msra.mxu0 %v154_v29  ;;  %999 = vmatpush3.msra.mxu1 %v1072_v4 }
  0x50   :  { %973 = vmatprep.subr.mxu0 %v1039_v0  ;;  %1000 = vmatprep.subr.mxu1 %v1039_v0 }
  0x51   :  { %974 = vmatpush3.msra.mxu0 %v161_v40  ;;  %1001 = vmatpush3.msra.mxu1 %v1074_v5 }
  0x52   :  { %975 = vmatprep.subr.mxu0 %v1039_v0  ;;  %1002 = vmatprep.subr.mxu1 %v1039_v0 }
  0x53   :  { %976 = vmatpush3.msra.mxu0 %v168_v46  ;;  %1003 = vmatpush3.msra.mxu1 %v1076_v6 }
  0x54   :  { %977 = vmatprep.subr.mxu0 %v1039_v0  ;;  %1004 = vmatprep.subr.mxu1 %v1039_v0 }
  0x55   :  { %978 = vmatpush3.msra.mxu0 %v175_v53  ;;  %1005 = vmatpush3.msra.mxu1 %v1091_v10 }
  0x56   :  { %979 = vmatprep.subr.mxu0 %v1039_v0  ;;  %1006 = vmatprep.subr.mxu1 %v1039_v0 }
  0x57   :  { %980 = vmatpush3.msra.mxu0 %v182_v57  ;;  %1007 = vmatpush3.msra.mxu1 %v1093_v11 }
  0x58   :  { %981 = vmatprep.subr.mxu0 %v1039_v0  ;;  %1008 = vmatprep.subr.mxu1 %v1039_v0 }
  0x59   :  { %982 = vmatpush3.msra.mxu0 %v189_v3  ;;  %1009 = vmatpush3.msra.mxu1 %v1095_v12 }
  0x5a   :  { %983 = vmatprep.subr.mxu0 %v1039_v0  ;;  %1010 = vmatprep.subr.mxu1 %v1039_v0 }
  0x5b   :  { %984 = vmatpush3.msra.mxu0 %v196_v19  ;;  %1011 = vmatpush3.msra.mxu1 %v1110_v17 }
  0x5c   :  { %985 = vmatprep.subr.mxu0 %v1039_v0  ;;  %1012 = vmatprep.subr.mxu1 %v1039_v0 }
  0x5d   :  { %986 = vmatpush3.msra.mxu0 %v203_v37  ;;  %1013 = vmatpush3.msra.mxu1 %v1129_v25 }
  0x5e   :  { %987 = vmatprep.subr.mxu0 %v1039_v0  ;;  %1014 = vmatprep.subr.mxu1 %v1039_v0 }
  0x5f   :  { %988 = vmatpush3.msra.mxu0 %v210_v44  ;;  %1015 = vmatpush3.msra.mxu1 %v1136_v28 }
  0x60   :  { %989 = vmatprep.subr.mxu0 %v1039_v0  ;;  %1016 = vmatprep.subr.mxu1 %v1039_v0 }
  0x61   :  { %990 = vmatpush3.msra.mxu0 %v217_v52  ;;  %1017 = vmatpush3.msra.mxu1 %v1156_v35 }
  0x62   :  { %991 = vmatprep.subr.mxu0 %v1039_v0  ;;  %1018 = vmatprep.subr.mxu1 %v1039_v0 }
  0x63   :  { %992 = vmatpush3.msra.mxu0 %v224_v1  ;;  %1019 = vmatpush3.msra.mxu1 %v1177_v45 }
  0x64   :  { %993 = vmatprep.subr.mxu0 %v1039_v0  ;;  %1020 = vmatprep.subr.mxu1 %v1039_v0 }
  0x65   :  { %994 = vmatpush3.msra.mxu0 %v231_v9  ;;  %995 = vmatprep.mubr.msk.f32.mxu0 %vm1040_vm0, %v1039_v0 }
  0x66   :  { %1021 = vmatpush3.msra.mxu1 %v1185_v48  ;;  %996 = vmatmul.mubr.f32.vlgmr.msra.gmra.mxu0 %v1219_v62 }
  0x67   :  { %1022 = vmatprep.subr.mxu1 %v1039_v0  ;;  %1030 = vmatprep.mubr.msk.f32.mxu1 %vm1040_vm0, %v1039_v0 }
  0x68   :  { %1023 = vmatpush3.msra.mxu1 %v1211_v59 }
  0x69   :  { %1024 = vmatprep.subr.mxu1 %v1039_v0 }
  0x6a   :  { %1025 = vmatpush3.msra.mxu1 %v1223_v63 }
  0x6b   :  { %1026 = vmatprep.subr.mxu1 %v1039_v0 }
  0x6c   :  { %1027 = vmatpush3.msra.mxu1 %v1241_v13 }
  0x6d   :  { %1028 = vmatprep.subr.mxu1 %v1039_v0 }
  0x6e   :  { %1029 = vmatpush3.msra.mxu1 %v1253_v32 }
  0x6f   :  { %1031 = vmatmul.mubr.f32.vlgmr.msra.gmra.mxu1 %v1219_v62 }
  0xe4   :  { %v119_v4 = vpop.f32.mrf.mxu0 }
  0xe6   :  { %v857_v5 = vpop.f32.mrf.mxu0 }
  0xeb   :  { %v270_v6 = vpop.f32.mrf.mxu1 }
  0xec   :  { %v271_v18 = vadd.f32 %v270_v6, %v119_v4 }
  0xed   :  { %v892_v10 = vpop.f32.mrf.mxu1 }
 0x104   :  { %v374_v11 = vpop.f32.mrf.mxu0 }
 0x105   :  { %v375_v21 = vadd.f32 %v374_v11, %v271_v18 }
 0x106   :  { %v927_v12 = vpop.f32.mrf.mxu0 }
 0x10d   :  { %v463_v15 = vpop.f32.mrf.mxu1 }
 0x10e   :  { %v464_v22 = vadd.f32 %v463_v15, %v375_v21 }
 0x10f   :  { %v962_v16 = vpop.f32.mrf.mxu1 }
 0x126   :  { %v582_v17 = vpop.f32.mrf.mxu0 }
 0x127   :  { %v583_v23 = vadd.f32 %v582_v17, %v464_v22 }
 0x128   :  { %v997_v20 = vpop.f32.mrf.mxu0 }
 0x12f   :  { %v669_v24 = vpop.f32.mrf.mxu1 }
 0x130   :  { %v670_v0 = vadd.f32 %v669_v24, %v583_v23 }
 0x131   :  { %v1032_v25 = vpop.f32.mrf.mxu1 }
 0x132   :  { %673 = vxpose.xlu0.b32.start.end [1/1] (short) (narrow) %v670_v0, 8 }
 0x1ae   :  { %v689_v28 = vpop.trf.xlu0 }
 0x1af   :  { %v707_v29 = vadd.f32 %v706_v27, %v689_v28 }
 0x1b1   :  { %v720_v30 = vmul.f32 -1.442695, %v707_v29 }
 0x1b3   :  { %1035 = vpow2.f32 %v720_v30 }
 0x1c0   :  { %v1036_v34 = vpop.eup %1035 }
 0x1c1   :  { %v711_v35 = vadd.f32 1.0, %v1036_v34 }
 0x1c3   :  { %1037 = vrcp.f32 %v711_v35 }
 0x1d0   :  { %v1038_v40 = vpop.eup %1037 }
 0x1d1   :  { %715 = vst.msk [vmem:[%s1484_s3] sm:$0xff] %vm714_vm1, %v1038_v40 }

</bundles_post_ra>
